<compile_context>
chip_gen: v7x
topology: tpu7x:2x2x1
jax: 0.10.0
libtpu: 0.0.40
codegen_flags: <defaults>
</compile_context>

<pallas_src>
import functools
import math

import jax
import jax.numpy as jnp
import numpy as np
from jax.experimental import pallas as pl
from jax.experimental.pallas import tpu as pltpu

TOKENS_PER_ROW = 128  # one full vreg lane-row of tokens per packed row


def _cdiv(a, b):
    return -(-a // b)


def _round_up(a, b):
    return _cdiv(a, b) * b


def _fsq_constants(levels, eps=1e-3):
    """Host-side per-channel FSQ constants (computed in f64, cast to f32)."""
    levels = np.asarray(levels, dtype=np.int64)
    half_l = (levels - 1).astype(np.float64) * (1.0 + eps) / 2.0
    offset = np.where(levels % 2 == 0, 0.5, 0.0)
    shift = np.arctanh(offset / half_l)
    half_w = (levels // 2).astype(np.float64)
    basis = np.cumprod(np.concatenate([[1], levels[:-1]])).astype(np.float64)
    return (half_l.astype(np.float32), offset.astype(np.float32),
            shift.astype(np.float32), half_w.astype(np.float32),
            basis.astype(np.float32))


def _fsq_kernel(z_ref, const_ref, sel_ref, quant_ref, tok_ref, *, token_offset):
    """One grid step: (tile_rows, C) latents -> quant + 128-wide token row."""
    z = z_ref[...]                               # (tile_rows, C) f32
    consts = const_ref[...]                      # (8, C) f32 constant block
    shift = consts[0:1, :]
    half_l = consts[1:2, :]
    offset = consts[2:3, :]
    inv_half_w = consts[3:4, :]

    # bound() + round + normalize (eval mode: plain rounding, no dropout).
    bounded = jnp.tanh(z + shift) * half_l - offset
    zhat = jnp.round(bounded)
    quant_ref[...] = (zhat * inv_half_w).astype(quant_ref.dtype)

    # codes_to_indices: per-token sum over its D lanes of zhat * basis, plus
    # the constant sum(half_width * basis).  The segmented lane reduction runs
    # on the otherwise-idle MXU via a static selector; all values are exact
    # integers in f32 (exact while codebook_size < 2**24).
    tok = jnp.dot(zhat, sel_ref[...], preferred_element_type=jnp.float32)
    tok_ref[...] = jnp.round(tok + token_offset).astype(jnp.int32)


def fsq_forward(z, levels, *, eps=1e-3, target_block_bytes=2 << 20):
    """z: (..., D) array with D == len(levels).

    Returns (quant (..., D) float32, tokens (...) int32).
    """
    levels_np = np.asarray(levels, dtype=np.int64)
    D = int(levels_np.shape[0])
    assert z.shape[-1] == D, f"expected last dim {D}, got {z.shape[-1]}"

    lead_shape = tuple(z.shape[:-1])
    T = int(np.prod(lead_shape)) if lead_shape else 1

    C = TOKENS_PER_ROW * D                 # packed lane width, multiple of 128

    # Host-side constants.
    half_l, offset, shift, half_w, basis_f32 = _fsq_constants(levels_np, eps)
    inv_half_w = (1.0 / half_w.astype(np.float64)).astype(np.float32)
    basis_i64 = np.cumprod(np.concatenate([[1], levels_np[:-1]])).astype(np.int64)
    token_offset = float(int(np.sum((levels_np // 2) * basis_i64)))

    # Per-lane constant block (rows: shift, half_l, offset, 1/half_w; padded to 8).
    const = np.zeros((8, C), np.float32)
    const[0] = np.tile(shift, TOKENS_PER_ROW)
    const[1] = np.tile(half_l, TOKENS_PER_ROW)
    const[2] = np.tile(offset, TOKENS_PER_ROW)
    const[3] = np.tile(inv_half_w, TOKENS_PER_ROW)

    # Segmented-reduction selector: column t has basis[d] at lane t*D + d.
    sel = np.zeros((C, TOKENS_PER_ROW), np.float32)
    sel[np.arange(C), np.arange(C) // D] = np.tile(basis_f32, TOKENS_PER_ROW)

    # Tile the packed-row axis: ~2 MiB input blocks (near HBM roofline and per-
    # step overhead amortized), balanced to minimize padding; small inputs
    # collapse to a single minimal block.
    R = _cdiv(T, TOKENS_PER_ROW)
    row_bytes = C * 4
    tr_cap = max(8, min(4096, (target_block_bytes // row_bytes) // 8 * 8))
    num_blocks = _cdiv(R, tr_cap)
    tile_rows = _round_up(_cdiv(R, num_blocks), 8)
    R_pad = num_blocks * tile_rows
    T_pad = R_pad * TOKENS_PER_ROW

    z_flat = jnp.asarray(z, jnp.float32).reshape(T, D)
    if T_pad != T:
        z_flat = jnp.pad(z_flat, ((0, T_pad - T), (0, 0)))
    z_packed = z_flat.reshape(R_pad, C)     # contiguous reshape: free

    kernel = functools.partial(_fsq_kernel, token_offset=token_offset)

    quant_p, tok_p = pl.pallas_call(
        kernel,
        out_shape=(
            jax.ShapeDtypeStruct((R_pad, C), jnp.float32),
            jax.ShapeDtypeStruct((R_pad, TOKENS_PER_ROW), jnp.int32),
        ),
        grid=(num_blocks,),
        in_specs=[
            pl.BlockSpec((tile_rows, C), lambda i: (i, 0)),
            pl.BlockSpec((8, C), lambda i: (0, 0)),                  # constants
            pl.BlockSpec((C, TOKENS_PER_ROW), lambda i: (0, 0)),     # selector
        ],
        out_specs=(
            pl.BlockSpec((tile_rows, C), lambda i: (i, 0)),
            pl.BlockSpec((tile_rows, TOKENS_PER_ROW), lambda i: (i, 0)),
        ),
        compiler_params=pltpu.CompilerParams(
            dimension_semantics=("parallel",)),
    )(z_packed, jnp.asarray(const), jnp.asarray(sel))

    quant = quant_p.reshape(T_pad, D)[:T].reshape(*lead_shape, D)
    tokens = tok_p.reshape(T_pad)[:T].reshape(lead_shape)
    return quant, tokens


def _fsq_reference(z, levels, eps=1e-3):
    """Pure-JAX reference mirroring the PyTorch eval-mode forward_z."""
    half_l, offset, shift, half_w, basis = _fsq_constants(levels, eps)
    z = jnp.asarray(z, jnp.float32)
    bounded = jnp.tanh(z + shift) * half_l - offset
    zhat = jnp.round(bounded)
    quant = zhat / half_w
    # codes_to_indices: scale_and_shift(quant) == zhat + half_w (exact form).
    tokens = jnp.sum((zhat + half_w) * basis, axis=-1).astype(jnp.int32)
    return quant, tokens


if __name__ == "__main__":
    levels = [8, 5, 5, 5]          # dim = 4, codebook_size = 1000
    B, N, D = 2, 8, len(levels)

    key = jax.random.PRNGKey(0)
    z = jax.random.normal(key, (B, N, D), dtype=jnp.float32) * 2.0

    quant, tokens = fsq_forward(z, levels)
    quant = jax.block_until_ready(quant)
    tokens = jax.block_until_ready(tokens)

    quant_ref, tokens_ref = _fsq_reference(z, levels)
    np.testing.assert_allclose(np.asarray(quant), np.asarray(quant_ref),
                               rtol=1e-5, atol=1e-5)
    np.testing.assert_array_equal(np.asarray(tokens), np.asarray(tokens_ref))

    # Second case: larger token count, exercises multi-row packed blocks.
    z2 = jax.random.normal(jax.random.PRNGKey(1), (2, 256, D),
                           dtype=jnp.float32) * 1.5
    quant2, tokens2 = fsq_forward(z2, levels)
    quant2 = jax.block_until_ready(quant2)
    tokens2 = jax.block_until_ready(tokens2)
    quant2_ref, tokens2_ref = _fsq_reference(z2, levels)
    np.testing.assert_allclose(np.asarray(quant2), np.asarray(quant2_ref),
                               rtol=1e-5, atol=1e-5)
    np.testing.assert_array_equal(np.asarray(tokens2), np.asarray(tokens2_ref))

    print("KERNEL_OK")
</pallas_src>

<mosaic_0001>
module attributes {stable_mosaic.version = 11 : i64} {
  func.func @_fsq_kernel(%arg0: i32, %arg1: memref<8x512xf32, #tpu.memory_space<vmem>>, %arg2: memref<8x512xf32, #tpu.memory_space<vmem>>, %arg3: memref<512x128xf32, #tpu.memory_space<vmem>>, %arg4: memref<8x512xf32, #tpu.memory_space<vmem>>, %arg5: memref<8x128xi32, #tpu.memory_space<vmem>>) attributes {dimension_semantics = [#tpu.dimension_semantics<parallel>], iteration_bounds = array<i64: 1>, scalar_prefetch = 0 : i64, scratch_operands = 0 : i64, tpu.core_type = #tpu.core_type<tc>, window_params = [{transform_indices = @transform_0, window_bounds = array<i64: 8, 512>}, {pipeline_mode = #tpu.pipeline_mode<synchronous>, transform_indices = @transform_1, window_bounds = array<i64: 8, 512>}, {pipeline_mode = #tpu.pipeline_mode<synchronous>, transform_indices = @transform_2, window_bounds = array<i64: 512, 128>}, {transform_indices = @transform_3, window_bounds = array<i64: 8, 512>}, {transform_indices = @transform_4, window_bounds = array<i64: 8, 128>}]} {
    %c0 = arith.constant 0 : index
    %c0_0 = arith.constant 0 : index
    %0 = vector.load %arg1[%c0, %c0_0] : memref<8x512xf32, #tpu.memory_space<vmem>>, vector<8x512xf32>
    %c0_1 = arith.constant 0 : index
    %c0_2 = arith.constant 0 : index
    %1 = vector.load %arg2[%c0_1, %c0_2] : memref<8x512xf32, #tpu.memory_space<vmem>>, vector<8x512xf32>
    %2 = vector.extract_strided_slice %1 {offsets = [0, 0], sizes = [1, 512], strides = [1, 1]} : vector<8x512xf32> to vector<1x512xf32>
    %3 = vector.extract_strided_slice %1 {offsets = [1, 0], sizes = [1, 512], strides = [1, 1]} : vector<8x512xf32> to vector<1x512xf32>
    %4 = vector.extract_strided_slice %1 {offsets = [2, 0], sizes = [1, 512], strides = [1, 1]} : vector<8x512xf32> to vector<1x512xf32>
    %5 = vector.extract_strided_slice %1 {offsets = [3, 0], sizes = [1, 512], strides = [1, 1]} : vector<8x512xf32> to vector<1x512xf32>
    %6 = vector.broadcast %2 : vector<1x512xf32> to vector<8x512xf32>
    %7 = arith.addf %0, %6 : vector<8x512xf32>
    %8 = math.tanh %7 : vector<8x512xf32>
    %9 = vector.broadcast %3 : vector<1x512xf32> to vector<8x512xf32>
    %10 = arith.mulf %8, %9 : vector<8x512xf32>
    %11 = vector.broadcast %4 : vector<1x512xf32> to vector<8x512xf32>
    %12 = arith.subf %10, %11 : vector<8x512xf32>
    %13 = math.roundeven %12 : vector<8x512xf32>
    %14 = vector.broadcast %5 : vector<1x512xf32> to vector<8x512xf32>
    %15 = arith.mulf %13, %14 : vector<8x512xf32>
    %c0_3 = arith.constant 0 : index
    %c0_4 = arith.constant 0 : index
    %16 = vector.load %arg4[%c0_3, %c0_4] : memref<8x512xf32, #tpu.memory_space<vmem>>, vector<8x512xf32>
    tpu.vector_store %arg4[%c0_3, %c0_4], %15 {strides = array<i32>} : memref<8x512xf32, #tpu.memory_space<vmem>>, vector<8x512xf32>,
    %c0_5 = arith.constant 0 : index
    %c0_6 = arith.constant 0 : index
    %17 = vector.load %arg3[%c0_5, %c0_6] : memref<512x128xf32, #tpu.memory_space<vmem>>, vector<512x128xf32>
    %cst = arith.constant dense<0.000000e+00> : vector<8x128xf32>
    %18 = tpu.matmul %13, %17, %cst {dimension_numbers = #tpu.dot_dimension_numbers<[1], [0], [0], [1], [0, 0, 1, 1], [], []>} : vector<8x512xf32>, vector<512x128xf32>, vector<8x128xf32> -> vector<8x128xf32>
    %cst_7 = arith.constant 5.000000e+02 : f32
    %19 = vector.broadcast %cst_7 : f32 to vector<8x128xf32>
    %20 = arith.addf %18, %19 : vector<8x128xf32>
    %21 = math.roundeven %20 : vector<8x128xf32>
    %22 = arith.fptosi %21 : vector<8x128xf32> to vector<8x128xi32>
    %c0_8 = arith.constant 0 : index
    %c0_9 = arith.constant 0 : index
    %23 = vector.load %arg5[%c0_8, %c0_9] : memref<8x128xi32, #tpu.memory_space<vmem>>, vector<8x128xi32>
    tpu.vector_store %arg5[%c0_8, %c0_9], %22 {strides = array<i32>} : memref<8x128xi32, #tpu.memory_space<vmem>>, vector<8x128xi32>,
    return
  }
  func.func @transform_0(%arg0: i32) -> (i32, i32) {
    %c0_i32 = arith.constant 0 : i32
    %c0_i32_0 = arith.constant 0 : i32
    return %arg0, %c0_i32 : i32, i32
  }
  func.func @transform_1(%arg0: i32) -> (i32, i32) {
    %c0_i32 = arith.constant 0 : i32
    %c0_i32_0 = arith.constant 0 : i32
    %c0_i32_1 = arith.constant 0 : i32
    return %c0_i32, %c0_i32_0 : i32, i32
  }
  func.func @transform_2(%arg0: i32) -> (i32, i32) {
    %c0_i32 = arith.constant 0 : i32
    %c0_i32_0 = arith.constant 0 : i32
    %c0_i32_1 = arith.constant 0 : i32
    return %c0_i32, %c0_i32_0 : i32, i32
  }
  func.func @transform_3(%arg0: i32) -> (i32, i32) {
    %c0_i32 = arith.constant 0 : i32
    %c0_i32_0 = arith.constant 0 : i32
    return %arg0, %c0_i32 : i32, i32
  }
  func.func @transform_4(%arg0: i32) -> (i32, i32) {
    %c0_i32 = arith.constant 0 : i32
    %c0_i32_0 = arith.constant 0 : i32
    return %arg0, %c0_i32 : i32, i32
  }
}

</mosaic_0001>

<bundles_post_ra>
// kernel: tpu_custom_call.1
= control target key start
LH: loop header
LB: loop body
LE: loop exit
PB: predicated region body
PF: predicated region fallthrough
CT: control target
= control target key end

     0   :  { %10 = vsyncpa [#allocation3], 0  ;;  %s787_s0 = inlined_call_operand.hbm [shape: f32[8,512], index: 0, kind: input, shape index: {}]   ;;  %s788_s1 = inlined_call_operand.hbm [shape: f32[8,512], index: 1, kind: input, shape index: {}]   ;;  %s789_s2 = inlined_call_operand.hbm [shape: f32[512,128], index: 2, kind: input, shape index: {}]   ;;  %s790_s3 = inlined_call_operand.hbm [shape: f32[8,512], index: 3, kind: output, shape index: {0}]   ;;  %s791_s4 = inlined_call_operand.hbm [shape: s32[8,128], index: 4, kind: output, shape index: {1}]  }
   0x1   :  { %11 = vsyncpa [#allocation6], 0 }
   0x2   :  { %12 = vsyncpa [#allocation4], 0 }
   0x3   :  { %13 = vsyncpa [#allocation10], 0  ;;  %s665_s15 = smov [#allocation5]   ;;  %s666_s17 = smov [#allocation2]  }
   0x4   :  { %s30_s16 = sshll.u32 %s665_s15, 4  ;;  %s20_s18 = sshll.u32 %s666_s17, 4  ;;  %s31_s16 = int_to_ptr.vmem [resolvable:$true] %s30_s16  ;;  %s21_s18 = int_to_ptr.vmem [resolvable:$true] %s20_s18 }
   0x5   :  { %s547_s21 = scalar_lea.hbm %s788_s1, 512 }
   0x6   :  { %p548_p0 = scmp.ne.s32.totalorder %s788_s1, %s547_s21  ;;  %p551_p1 = scmp.lt.u32.totalorder %s547_s21, %s788_s1 }
   0x8   :  { %p553_p2 = pnand %p551_p1, %p548_p0 }
   0xa   :  { %556 = shalt.err (!%p553_p2)
}
   0xb   :  { %s557_s26 = scalar_lea.vmem %s31_s16, 512  ;;  %p562_p4 = scmp.lt.s32.totalorder %s31_s16, %s31_s16 }
   0xc   :  { %p558_p3 = scmp.ne.s32.totalorder %s31_s16, %s557_s26  ;;  %p563_p5 = scmp.lt.s32.totalorder %s557_s26, %s557_s26 }
   0xe   :  { %p564_p6 = por %p563_p5, %p562_p4 }
  0x10   :  { %p565_p7 = pnand %p564_p6, %p558_p3 }
  0x12   :  { %568 = shalt.err (!%p565_p7)
}
  0x13   :  { %33 = dma.hbm_to_vmem [thread:$0]  %s788_s1, 512, %s31_s16, [#allocation6]  }
  0x14   :  { %s569_s5 = scalar_lea.hbm %s787_s0, 512 }
  0x15   :  { %p570_p8 = scmp.ne.s32.totalorder %s787_s0, %s569_s5  ;;  %p573_p9 = scmp.lt.u32.totalorder %s569_s5, %s787_s0 }
  0x17   :  { %p575_p10 = pnand %p573_p9, %p570_p8 }
  0x19   :  { %578 = shalt.err (!%p575_p10)
}
  0x1a   :  { %s579_s10 = scalar_lea.vmem %s21_s18, 512  ;;  %p584_p12 = scmp.lt.s32.totalorder %s21_s18, %s21_s18 }
  0x1b   :  { %p580_p11 = scmp.ne.s32.totalorder %s21_s18, %s579_s10  ;;  %p585_p13 = scmp.lt.s32.totalorder %s579_s10, %s579_s10 }
  0x1d   :  { %p586_p0 = por %p585_p13, %p584_p12 }
  0x1f   :  { %p587_p1 = pnand %p586_p0, %p580_p11 }
  0x21   :  { %590 = shalt.err (!%p587_p1)
}
  0x22   :  { %23 = dma.hbm_to_vmem [thread:$0]  %s787_s0, 512, %s21_s18, [#allocation3]  }
  0x23   :  { %s667_s12 = smov [#allocation7]   ;;  %s591_s16 = scalar_lea.hbm %s789_s2, 8192 }
  0x24   :  { %s39_s13 = sshll.u32 %s667_s12, 4  ;;  %p592_p2 = scmp.ne.s32.totalorder %s789_s2, %s591_s16  ;;  %s40_s13 = int_to_ptr.vmem [resolvable:$true] %s39_s13 }
  0x25   :  { %p595_p3 = scmp.lt.u32.totalorder %s591_s16, %s789_s2 }
  0x27   :  { %p597_p4 = pnand %p595_p3, %p592_p2 }
  0x29   :  { %600 = shalt.err (!%p597_p4)
}
  0x2a   :  { %s601_s22 = scalar_lea.vmem %s40_s13, 8192  ;;  %p606_p6 = scmp.lt.s32.totalorder %s40_s13, %s40_s13 }
  0x2b   :  { %p602_p5 = scmp.ne.s32.totalorder %s40_s13, %s601_s22  ;;  %p607_p7 = scmp.lt.s32.totalorder %s601_s22, %s601_s22 }
  0x2d   :  { %p608_p8 = por %p607_p7, %p606_p6 }
  0x2f   :  { %p609_p9 = pnand %p608_p8, %p602_p5 }
  0x31   :  { %612 = shalt.err (!%p609_p9)
}
  0x32   :  { %s668_s0 = smov 128   ;;  %s669_s18 = smov 8  }
  0x33   :  { %45 = dma.hbm_to_vmem [thread:$0]  %s789_s2, 8192, %s40_s13, [#allocation6], %s668_s0, %s668_s0, %s669_s18  }
  0x34   :  { %657 = dma.done.wait [#allocation3], 512  }
  0x35   :  { %658 = vsyncadd [#allocation3], 4294966784 }
  0x36   :  { %659 = dma.done.wait [#allocation6], 8704  }
  0x37   :  { %660 = vsyncadd [#allocation6], 4294958592  ;;  %v171_v0 = vld [vmem:[#allocation7 + $0x80] sm:$0xff]  ;;  %v172_v1 = vld [vmem:[#allocation7 + $0x88] sm:$0xff]  ;;  %v63_v47 = vlaneseq  ;;  %s670_s2 = smov [#allocation8]  }
  0x38   :  { %v155_v2 = vld [vmem:[#allocation7] sm:$0xff]  ;;  %v461_v3 = vpack.c.bf16 %v172_v1, %v171_v0  ;;  %v156_v4 = vld [vmem:[#allocation7 + $0x8] sm:$0xff]  ;;  %v173_v11 = vld [vmem:[#allocation7 + $0x90] sm:$0xff]  ;;  %s367_s25 = sshll.u32 %s670_s2, 4  ;;  %s368_s25 = int_to_ptr.vmem [resolvable:$true] %s367_s25 }
  0x39   :  { %v203_v5 = vld [vmem:[#allocation7 + $0x180] sm:$0xff]  ;;  %v204_v6 = vld [vmem:[#allocation7 + $0x188] sm:$0xff]  ;;  %v463_v7 = vpack.c.bf16 %v156_v4, %v155_v2  ;;  %v174_v13 = vld [vmem:[#allocation7 + $0x98] sm:$0xff]  ;;  %v733_v61 = vshrl.u32 %v63_v47, 7  ;;  %s613_s26 = scalar_lea.vmem %s368_s25, 512  ;;  %p618_p11 = scmp.lt.s32.totalorder %s368_s25, %s368_s25 }
  0x3a   :  { %v493_v8 = vpack.c.bf16 %v204_v6, %v203_v5  ;;  %v187_v9 = vld [vmem:[#allocation7 + $0x100] sm:$0xff]  ;;  %v188_v10 = vld [vmem:[#allocation7 + $0x108] sm:$0xff]  ;;  %462 = vmatprep.subr.bf16.mxu0 %v461_v3  ;;  %v157_v14 = vld [vmem:[#allocation7 + $0x10] sm:$0xff]  ;;  %v465_v16 = vpack.c.bf16 %v174_v13, %v173_v11  ;;  %p614_p10 = scmp.ne.s32.totalorder %s368_s25, %s613_s26  ;;  %p619_p12 = scmp.lt.s32.totalorder %s613_s26, %s613_s26 }
  0x3b   :  { %v495_v12 = vpack.c.bf16 %v188_v10, %v187_v9  ;;  %v158_v15 = vld [vmem:[#allocation7 + $0x18] sm:$0xff]  ;;  %464 = vmatpush3.bf16.msra.mxu0 %v463_v7  ;;  %v205_v18 = vld [vmem:[#allocation7 + $0x190] sm:$0xff]  ;;  %v175_v23 = vld [vmem:[#allocation7 + $0xa0] sm:$0xff]  ;;  %v65_v10 = vsub.s32 0, %v733_v61 }
  0x3c   :  { %494 = vmatprep.subr.bf16.mxu1 %v493_v8  ;;  %v467_v17 = vpack.c.bf16 %v158_v15, %v157_v14  ;;  %v206_v19 = vld [vmem:[#allocation7 + $0x198] sm:$0xff]  ;;  %v189_v20 = vld [vmem:[#allocation7 + $0x110] sm:$0xff]  ;;  %v176_v24 = vld [vmem:[#allocation7 + $0xa8] sm:$0xff]  ;;  %466 = vmatprep.subr.bf16.mxu0 %v465_v16  ;;  %p620_p13 = por %p619_p12, %p618_p11 }
  0x3d   :  { %496 = vmatpush3.bf16.msra.mxu1 %v495_v12  ;;  %v497_v21 = vpack.c.bf16 %v206_v19, %v205_v18  ;;  %v190_v22 = vld [vmem:[#allocation7 + $0x118] sm:$0xff]  ;;  %v469_v26 = vpack.c.bf16 %v176_v24, %v175_v23  ;;  %v159_v27 = vld [vmem:[#allocation7 + $0x20] sm:$0xff]  ;;  %v160_v28 = vld [vmem:[#allocation7 + $0x28] sm:$0xff] }
  0x3e   :  { %v499_v25 = vpack.c.bf16 %v190_v22, %v189_v20  ;;  %v207_v29 = vld [vmem:[#allocation7 + $0x1a0] sm:$0xff]  ;;  %v208_v30 = vld [vmem:[#allocation7 + $0x1a8] sm:$0xff]  ;;  %v471_v33 = vpack.c.bf16 %v160_v28, %v159_v27  ;;  %v177_v35 = vld [vmem:[#allocation7 + $0xb0] sm:$0xff]  ;;  %p621_p0 = pnand %p620_p13, %p614_p10 }
  0x3f   :  { %498 = vmatprep.subr.bf16.mxu1 %v497_v21  ;;  %v191_v31 = vld [vmem:[#allocation7 + $0x120] sm:$0xff]  ;;  %v192_v32 = vld [vmem:[#allocation7 + $0x128] sm:$0xff]  ;;  %468 = vmatpush3.bf16.msra.mxu0 %v467_v17  ;;  %v501_v34 = vpack.c.bf16 %v208_v30, %v207_v29  ;;  %v178_v36 = vld [vmem:[#allocation7 + $0xb8] sm:$0xff] }
  0x40   :  { %v161_v37 = vld [vmem:[#allocation7 + $0x30] sm:$0xff]  ;;  %470 = vmatprep.subr.bf16.mxu0 %v469_v26  ;;  %v503_v38 = vpack.c.bf16 %v192_v32, %v191_v31  ;;  %v473_v39 = vpack.c.bf16 %v178_v36, %v177_v35  ;;  %v162_v40 = vld [vmem:[#allocation7 + $0x38] sm:$0xff]  ;;  %v179_v46 = vld [vmem:[#allocation7 + $0xc0] sm:$0xff] }
  0x41   :  { %500 = vmatpush3.bf16.msra.mxu1 %v499_v25  ;;  %v209_v41 = vld [vmem:[#allocation7 + $0x1b0] sm:$0xff]  ;;  %v210_v42 = vld [vmem:[#allocation7 + $0x1b8] sm:$0xff]  ;;  %v180_v48 = vld [vmem:[#allocation7 + $0xc8] sm:$0xff]  ;;  %v475_v49 = vpack.c.bf16 %v162_v40, %v161_v37 }
  0x42   :  { %502 = vmatprep.subr.bf16.mxu1 %v501_v34  ;;  %v505_v43 = vpack.c.bf16 %v210_v42, %v209_v41  ;;  %v193_v44 = vld [vmem:[#allocation7 + $0x130] sm:$0xff]  ;;  %v194_v45 = vld [vmem:[#allocation7 + $0x138] sm:$0xff]  ;;  %v211_v50 = vld [vmem:[#allocation7 + $0x1c0] sm:$0xff]  ;;  %v477_v53 = vpack.c.bf16 %v180_v48, %v179_v46 }
  0x43   :  { %472 = vmatpush3.bf16.msra.mxu0 %v471_v33  ;;  %v212_v51 = vld [vmem:[#allocation7 + $0x1c8] sm:$0xff]  ;;  %v507_v52 = vpack.c.bf16 %v194_v45, %v193_v44  ;;  %v163_v54 = vld [vmem:[#allocation7 + $0x40] sm:$0xff]  ;;  %v181_v59 = vld [vmem:[#allocation7 + $0xd0] sm:$0xff] }
  0x44   :  { %474 = vmatprep.subr.bf16.mxu0 %v473_v39  ;;  %v164_v55 = vld [vmem:[#allocation7 + $0x48] sm:$0xff]  ;;  %v195_v56 = vld [vmem:[#allocation7 + $0x140] sm:$0xff]  ;;  %v509_v57 = vpack.c.bf16 %v212_v51, %v211_v50  ;;  %v182_v60 = vld [vmem:[#allocation7 + $0xd8] sm:$0xff]  ;;  %v89_v51 = vsub.s32 1, %v733_v61 }
  0x45   :  { %504 = vmatpush3.bf16.msra.mxu1 %v503_v38  ;;  %v196_v58 = vld [vmem:[#allocation7 + $0x148] sm:$0xff]  ;;  %v213_v62 = vld [vmem:[#allocation7 + $0x1d0] sm:$0xff]  ;;  %v214_v63 = vld [vmem:[#allocation7 + $0x1d8] sm:$0xff]  ;;  %v479_v0 = vpack.c.bf16 %v164_v55, %v163_v54  ;;  %v481_v2 = vpack.c.bf16 %v182_v60, %v181_v59 }
  0x46   :  { %506 = vmatprep.subr.bf16.mxu1 %v505_v43  ;;  %v511_v1 = vpack.c.bf16 %v196_v58, %v195_v56  ;;  %v165_v3 = vld [vmem:[#allocation7 + $0x50] sm:$0xff]  ;;  %v166_v4 = vld [vmem:[#allocation7 + $0x58] sm:$0xff]  ;;  %v513_v6 = vpack.c.bf16 %v214_v63, %v213_v62  ;;  %v183_v8 = vld [vmem:[#allocation7 + $0xe0] sm:$0xff]  ;;  %v133_v56 = vsub.s32 3, %v733_v61 }
  0x47   :  { %476 = vmatpush3.bf16.msra.mxu0 %v475_v49  ;;  %v197_v5 = vld [vmem:[#allocation7 + $0x150] sm:$0xff]  ;;  %v198_v7 = vld [vmem:[#allocation7 + $0x158] sm:$0xff]  ;;  %v184_v9 = vld [vmem:[#allocation7 + $0xe8] sm:$0xff]  ;;  %v483_v15 = vpack.c.bf16 %v166_v4, %v165_v3 }
  0x48   :  { %478 = vmatprep.subr.bf16.mxu0 %v477_v53  ;;  %v167_v11 = vld [vmem:[#allocation7 + $0x60] sm:$0xff]  ;;  %v168_v12 = vld [vmem:[#allocation7 + $0x68] sm:$0xff]  ;;  %v185_v18 = vld [vmem:[#allocation7 + $0xf0] sm:$0xff]  ;;  %v515_v20 = vpack.c.bf16 %v198_v7, %v197_v5  ;;  %v485_v21 = vpack.c.bf16 %v184_v9, %v183_v8 }
  0x49   :  { %508 = vmatpush3.bf16.msra.mxu1 %v507_v52  ;;  %v215_v13 = vld [vmem:[#allocation7 + $0x1e0] sm:$0xff]  ;;  %v216_v14 = vld [vmem:[#allocation7 + $0x1e8] sm:$0xff]  ;;  %v186_v19 = vld [vmem:[#allocation7 + $0xf8] sm:$0xff]  ;;  %v487_v34 = vpack.c.bf16 %v168_v12, %v167_v11  ;;  %v109_v52 = vsub.s32 2, %v733_v61 }
  0x4a   :  { %510 = vmatprep.subr.bf16.mxu1 %v509_v57  ;;  %v199_v16 = vld [vmem:[#allocation7 + $0x160] sm:$0xff]  ;;  %v200_v17 = vld [vmem:[#allocation7 + $0x168] sm:$0xff]  ;;  %v217_v22 = vld [vmem:[#allocation7 + $0x1f0] sm:$0xff]  ;;  %v517_v25 = vpack.c.bf16 %v216_v14, %v215_v13  ;;  %v489_v38 = vpack.c.bf16 %v186_v19, %v185_v18 }
  0x4b   :  { %480 = vmatpush3.bf16.msra.mxu0 %v479_v0  ;;  %v56_v23 = vld [vmem:[#allocation2 + $0x8] sm:$0xff]  ;;  %v218_v26 = vld [vmem:[#allocation7 + $0x1f8] sm:$0xff]  ;;  %v55_v28 = vld [vmem:[#allocation2] sm:$0xff]  ;;  %v519_v37 = vpack.c.bf16 %v200_v17, %v199_v16 }
  0x4c   :  { %482 = vmatprep.subr.bf16.mxu0 %v481_v2  ;;  %v736_v24 = vld [vmem:[#allocation5 + $0x8] sm:$0xff]  ;;  %v739_v29 = vld [vmem:[#allocation5] sm:$0xff]  ;;  %v58_v31 = vld [vmem:[#allocation2 + $0x18] sm:$0xff]  ;;  %v521_v43 = vpack.c.bf16 %v218_v26, %v217_v22 }
  0x4d   :  { %512 = vmatpush3.bf16.msra.mxu1 %v511_v1  ;;  %v70_v27 = vrot.slane %v736_v24, %v65_v10  ;;  %v66_v30 = vrot.slane %v739_v29, %v65_v10  ;;  %v742_v32 = vld [vmem:[#allocation5 + $0x18] sm:$0xff]  ;;  %v744_v33 = vld [vmem:[#allocation5 + $0x10] sm:$0xff]  ;;  %v94_v53 = vrot.slane %v736_v24, %v89_v51  ;;  %v90_v54 = vrot.slane %v739_v29, %v89_v51 }
  0x4e   :  { %514 = vmatprep.subr.bf16.mxu1 %v513_v6  ;;  %v78_v36 = vrot.slane %v742_v32, %v65_v10  ;;  %v169_v39 = vld [vmem:[#allocation7 + $0x70] sm:$0xff]  ;;  %v170_v40 = vld [vmem:[#allocation7 + $0x78] sm:$0xff]  ;;  %v74_v47 = vrot.slane %v744_v33, %v65_v10  ;;  %v114_v55 = vrot.slane %v736_v24, %v109_v52  ;;  %v102_v57 = vrot.slane %v742_v32, %v89_v51 }
  0x4f   :  { %484 = vmatpush3.bf16.msra.mxu0 %v483_v15  ;;  %v80_v35 = vadd.f32 %v70_v27, %v56_v23  ;;  %v79_v41 = vadd.f32 %v66_v30, %v55_v28  ;;  %v57_v42 = vld [vmem:[#allocation2 + $0x10] sm:$0xff]  ;;  %v202_v45 = vld [vmem:[#allocation7 + $0x178] sm:$0xff]  ;;  %v491_v48 = vpack.c.bf16 %v170_v40, %v169_v39  ;;  %v110_v59 = vrot.slane %v739_v29, %v109_v52 }
  0x50   :  { %486 = vmatprep.subr.bf16.mxu0 %v485_v21  ;;  %v201_v44 = vld [vmem:[#allocation7 + $0x170] sm:$0xff]  ;;  %v82_v46 = vadd.f32 %v78_v36, %v58_v31  ;;  %v81_v49 = vadd.f32 %v74_v47, %v57_v42  ;;  %v122_v63 = vrot.slane %v742_v32, %v109_v52  ;;  %v98_v0 = vrot.slane %v744_v33, %v89_v51 }
  0x51   :  { %516 = vmatpush3.bf16.msra.mxu1 %v515_v20  ;;  %539 = vtanh.f32 %v80_v35  ;;  %v523_v50 = vpack.c.bf16 %v202_v45, %v201_v44  ;;  %v138_v4 = vrot.slane %v736_v24, %v133_v56  ;;  %v118_v6 = vrot.slane %v744_v33, %v109_v52 }
  0x52   :  { %518 = vmatprep.subr.bf16.mxu1 %v517_v25  ;;  %541 = vtanh.f32 %v79_v41  ;;  %v134_v8 = vrot.slane %v739_v29, %v133_v56  ;;  %v146_v11 = vrot.slane %v742_v32, %v133_v56  ;;  %v142_v17 = vrot.slane %v744_v33, %v133_v56 }
  0x53   :  { %488 = vmatpush3.bf16.msra.mxu0 %v487_v34  ;;  %543 = vtanh.f32 %v82_v46 }
  0x54   :  { %490 = vmatprep.subr.bf16.mxu0 %v489_v38  ;;  %545 = vtanh.f32 %v81_v49 }
  0x55   :  { %520 = vmatpush3.bf16.msra.mxu1 %v519_v37 }
  0x56   :  { %522 = vmatprep.subr.bf16.mxu1 %v521_v43 }
  0x57   :  { %492 = vmatpush3.bf16.msra.mxu0 %v491_v48 }
  0x59   :  { %524 = vmatpush3.bf16.msra.mxu1 %v523_v50 }
  0x5b   :  { %v540_v58 = vpop.eup %539 }
  0x5c   :  { %v542_v60 = vpop.eup %541  ;;  %v104_v62 = vmul.f32 %v540_v58, %v94_v53 }
  0x5d   :  { %v544_v1 = vpop.eup %543  ;;  %v103_v2 = vmul.f32 %v542_v60, %v90_v54 }
  0x5e   :  { %v124_v3 = vsub.f32 %v104_v62, %v114_v55  ;;  %v106_v5 = vmul.f32 %v544_v1, %v102_v57  ;;  %v546_v61 = vpop.eup %545 }
  0x5f   :  { %v123_v7 = vsub.f32 %v103_v2, %v110_v59  ;;  %v105_v12 = vmul.f32 %v546_v61, %v98_v0 }
  0x60   :  { %v526_v9 = vround.rtne.f32 %v124_v3  ;;  %v126_v10 = vsub.f32 %v106_v5, %v122_v63 }
  0x61   :  { %v525_v13 = vround.rtne.f32 %v123_v7  ;;  %v125_v16 = vsub.f32 %v105_v12, %v118_v6 }
  0x62   :  { %v148_v14 = vmul.f32 %v526_v9, %v138_v4  ;;  %283 = vmatprep.mubr.f32.mxu0 %v526_v9  ;;  %v528_v15 = vround.rtne.f32 %v126_v10 }
  0x63   :  { %v147_v18 = vmul.f32 %v525_v13, %v134_v8  ;;  %284 = vmatmul.mubr.f32.vlgmr.msra.gmra.mrb[0].mxu0 %v525_v13  ;;  %v527_v20 = vround.rtne.f32 %v125_v16 }
  0x64   :  { %152 = vst [vmem:[#allocation8 + $0x8] sm:$0xff] %v148_v14  ;;  %v150_v19 = vmul.f32 %v528_v15, %v146_v11  ;;  %353 = vmatprep.mubr.f32.mxu1 %v528_v15 }
  0x65   :  { %151 = vst [vmem:[#allocation8] sm:$0xff] %v147_v18  ;;  %v149_v21 = vmul.f32 %v527_v20, %v142_v17  ;;  %354 = vmatmul.mubr.f32.vlgmr.msra.gmra.mrb[0].mxu1 %v527_v20 }
  0x66   :  { %154 = vst [vmem:[#allocation8 + $0x18] sm:$0xff] %v150_v19 }
  0x67   :  { %153 = vst [vmem:[#allocation8 + $0x10] sm:$0xff] %v149_v21 }
  0x68   :  { %624 = shalt.err (!%p621_p0)
}
  0x69   :  { %s625_s29 = scalar_lea.hbm %s790_s3, 512 }
  0x6a   :  { %p626_p1 = scmp.ne.s32.totalorder %s790_s3, %s625_s29  ;;  %p629_p2 = scmp.lt.u32.totalorder %s625_s29, %s790_s3 }
  0x6c   :  { %p631_p3 = pnand %p629_p2, %p626_p1 }
  0x6e   :  { %634 = shalt.err (!%p631_p3)
}
  0x6f   :  { %370 = dma.vmem_to_hbm [thread:$0]  %s368_s25, 512, %s790_s3, [#allocation4]  }
  0x70   :  { %s671_s10 = smov [#allocation9]  }
  0x71   :  { %s377_s1 = sshll.u32 %s671_s10, 4  ;;  %s378_s1 = int_to_ptr.vmem [resolvable:$true] %s377_s1 }
  0x72   :  { %s635_s11 = scalar_lea.vmem %s378_s1, 128  ;;  %p640_p5 = scmp.lt.s32.totalorder %s378_s1, %s378_s1 }
  0x73   :  { %p636_p4 = scmp.ne.s32.totalorder %s378_s1, %s635_s11  ;;  %p641_p6 = scmp.lt.s32.totalorder %s635_s11, %s635_s11 }
  0x75   :  { %p642_p7 = por %p641_p6, %p640_p5 }
  0x77   :  { %p643_p8 = pnand %p642_p7, %p636_p4 }
 0x136   :  { %v423_v22 = vpop.f32.mrb[0].mxu0 }
 0x137   :  { %v424_v23 = vpop.f32.mrb[1].mxu0 }
 0x138   :  { %v425_v24 = vadd.f32 %v424_v23, %v423_v22  ;;  %v458_v25 = vpop.f32.mrb[0].mxu1 }
 0x139   :  { %v459_v27 = vpop.f32.mrb[1].mxu1 }
 0x13a   :  { %v286_v26 = vadd.f32 500.0, %v425_v24  ;;  %v460_v28 = vadd.f32 %v459_v27, %v458_v25 }
 0x13c   :  { %v356_v29 = vadd.f32 %v460_v28, %v286_v26 }
 0x13e   :  { %v531_v30 = vcvt.f32.s32 %v356_v29 }
 0x140   :  { %360 = vst [vmem:[#allocation9] sm:$0xff] %v531_v30 }
 0x141   :  { %646 = shalt.err (!%p643_p8)
}
 0x142   :  { %s647_s13 = scalar_lea.hbm %s791_s4, 128 }
 0x143   :  { %p648_p9 = scmp.ne.s32.totalorder %s791_s4, %s647_s13  ;;  %p651_p10 = scmp.lt.u32.totalorder %s647_s13, %s791_s4 }
 0x145   :  { %p653_p11 = pnand %p651_p10, %p648_p9 }
 0x147   :  { %656 = shalt.err (!%p653_p11)
}
 0x148   :  { %380 = dma.vmem_to_hbm [thread:$0]  %s378_s1, 128, %s791_s4, [#allocation10]  }
 0x149   :  { %661 = dma.done.wait [#allocation4], 512  }
 0x14a   :  { %662 = vsyncadd [#allocation4], 4294966784 }
 0x14b   :  { %663 = dma.done.wait [#allocation10], 128  }
 0x14c   :  { %664 = vsyncadd [#allocation10], 4294967168 }
 0x14d   :  { %387 = vsyncpa [#allocation3], 1 }
 0x14e   :  { %388 = vsyncpa [#allocation6], 1 }
 0x14f   :  { %389 = vsyncpa [#allocation4], 1 }
 0x150   :  { %390 = vsyncpa [#allocation10], 1 }

</bundles_post_ra>
